<compile_context>
chip_gen: v6e
topology: v6e:2x2x1
jax: 0.10.0
libtpu: 0.0.40
codegen_flags: <defaults>
</compile_context>

<pallas_src>
import functools

import jax
import jax.numpy as jnp
from jax.experimental import pallas as pl
from jax.experimental.pallas import tpu as pltpu


# ----------------------------------------------------------------------------
# Kernel
# ----------------------------------------------------------------------------
def mtl_forward_kernel(x_ref, y_ref, p_ref, loss_ref, *,
                       n_layers, d_in, H, T, inv_b):
    """Fused trunk (n_layers x Linear+ReLU) + heads + per-task MSE.

    x_ref:    (tb, d_in)            f32 input tile
    y_ref:    (tb, T)               f32 target tile
    p_ref:    ((n_layers+1)*H + 8, H)  bf16 parameter slab:
                rows [l*H,(l+1)*H)      trunk weight l, (in,out) layout
                rows [n_layers*H, +H)   head weights (H,T) zero-padded to (H,H)
                rows [(n_layers+1)*H,+8) biases: rows 0..n_layers-1 trunk,
                                         row n_layers head bias (cols >= T zero)
    loss_ref: (1, T)                f32 per-task MSE accumulator (resident)
    """
    step = pl.program_id(0)

    @pl.when(step == 0)
    def _init():
        loss_ref[...] = jnp.zeros_like(loss_ref)

    bias0 = (n_layers + 1) * H
    # One aligned load for all biases, then static register-level row slices.
    biases = p_ref[bias0:bias0 + 8, :].astype(jnp.float32)          # (8, H) f32

    # ---- shared trunk: fc1..fc4, bf16 MXU dots, f32 accum + f32 VPU math ----
    h = x_ref[...]                                                   # (tb, d_in) f32
    for layer in range(n_layers):
        rows = d_in if layer == 0 else H
        w = p_ref[layer * H: layer * H + rows, :]                    # (rows, H) bf16
        b = biases[layer:layer + 1, :]                               # (1, H) f32
        h = jnp.dot(h.astype(jnp.bfloat16), w,
                    preferred_element_type=jnp.float32)
        h = jnp.maximum(h + b, 0.0)

    # ---- task heads: stacked Linear(H,1) as one (H, H) block (cols>=T zero) --
    wh = p_ref[n_layers * H:(n_layers + 1) * H, :]                   # (H, H) bf16
    bh = biases[n_layers:n_layers + 1, :]                            # (1, H) f32
    yp = jnp.dot(h.astype(jnp.bfloat16), wh,
                 preferred_element_type=jnp.float32) + bh            # (tb, H)

    # ---- per-task MSE: loss[i] += (1/B) * sum_b (y[b,i] - yp[b,i])^2 --------
    diff = y_ref[...] - yp[:, :T]                                    # (tb, T)
    loss_ref[...] += jnp.sum(diff * diff, axis=0, keepdims=True) * inv_b


# ----------------------------------------------------------------------------
# One-time parameter packing (all layout plumbing hoisted out of the hot path)
# ----------------------------------------------------------------------------
def pack_params(params, dtype=jnp.bfloat16):
    """Pack PyTorch-layout params into ONE kernel-friendly slab. Call once."""
    n_layers = 4
    T, _, H = params["heads_w"].shape
    d_in = params["fc1_w"].shape[1]

    assert H % 16 == 0, "hidden must be a multiple of 16 (bf16 sublane tiling)"
    assert d_in <= H and d_in % 16 == 0, (
        "pack_params assumes d_in <= hidden and d_in % 16 == 0")
    # TODO(synk): general d_in would need an in-kernel zero-padded x scratch.
    assert T <= H, "n_tasks must be <= hidden for the packed head block"

    # Trunk weights -> (in, out); zero-pad fc1's input dim up to H so all
    # blocks share the (.., H) slab width (kernel only reads the first d_in
    # rows of fc1, so padding is never touched).
    w1t = params["fc1_w"].T                                          # (d_in, H)
    if d_in < H:
        w1t = jnp.pad(w1t, ((0, H - d_in), (0, 0)))
    blocks = [w1t, params["fc2_w"].T, params["fc3_w"].T, params["fc4_w"].T]

    # Head weights (H, T), zero-padded to (H, H).
    wh = params["heads_w"].reshape(T, H).T                           # (H, T)
    blocks.append(jnp.pad(wh, ((0, 0), (0, H - T))))                 # (H, H)

    # Biases: 8 rows (aligned block), rows 0..3 trunk, row 4 head, rest zero.
    biases = jnp.zeros((8, H), jnp.float32)
    biases = biases.at[0, :].set(params["fc1_b"])
    biases = biases.at[1, :].set(params["fc2_b"])
    biases = biases.at[2, :].set(params["fc3_b"])
    biases = biases.at[3, :].set(params["fc4_b"])
    biases = biases.at[n_layers, :T].set(params["heads_b"])
    blocks.append(biases)

    slab = jnp.concatenate(blocks, axis=0).astype(dtype)             # (5H+8, H)
    return slab


# ----------------------------------------------------------------------------
# Forward wrapper
# ----------------------------------------------------------------------------
@jax.jit
def _mtl_losses(x, y, p_slab):
    B, d_in = x.shape
    T = y.shape[1]
    H = p_slab.shape[1]
    n_layers = (p_slab.shape[0] - 8) // H - 1

    tb = B if B <= 128 else 128          # batch tile (static under jit)
    assert B % tb == 0
    nb = B // tb

    kern = functools.partial(mtl_forward_kernel, n_layers=n_layers,
                             d_in=d_in, H=H, T=T, inv_b=1.0 / B)

    mat_flops = 2 * B * (d_in * H + (n_layers - 1) * H * H + H * H)
    vpu_flops = 2 * n_layers * B * H + 4 * B * T
    bytes_accessed = int(x.size * 4 + y.size * 4
                         + p_slab.size * p_slab.dtype.itemsize + T * 4)

    loss2d = pl.pallas_call(
        kern,
        out_shape=jax.ShapeDtypeStruct((1, T), jnp.float32),
        grid=(nb,),
        in_specs=[
            pl.BlockSpec((tb, d_in), lambda i: (i, 0)),      # stream x tiles
            pl.BlockSpec((tb, T), lambda i: (i, 0)),         # stream y tiles
            pl.BlockSpec(p_slab.shape, lambda i: (0, 0)),    # params VMEM-resident
        ],
        out_specs=pl.BlockSpec((1, T), lambda i: (0, 0)),    # resident accumulator
        compiler_params=pltpu.CompilerParams(
            # Batch is the MSE reduction axis -> "arbitrary".
            # (Set vmem_limit_bytes explicitly only when H grows large.)
            dimension_semantics=("arbitrary",)),
        cost_estimate=pl.CostEstimate(flops=mat_flops + vpu_flops,
                                      transcendentals=0,
                                      bytes_accessed=bytes_accessed),
    )(x, y, p_slab)
    return loss2d.reshape(T)


def mtl_net_forward(x, y, p_slab, params):
    """mtlNet.forward: (per-task losses [T], stacked head weights [T,1,H], fc4 weight [H,H])."""
    losses = _mtl_losses(x, y, p_slab)
    return losses, params["heads_w"], params["fc4_w"]


# ----------------------------------------------------------------------------
# Parameter init (PyTorch nn.Linear-style) and pure-JAX references
# ----------------------------------------------------------------------------
def init_params(key, d_in, hidden, n_tasks):
    ks = jax.random.split(key, 4 + n_tasks)

    def lin(k, out_dim, in_dim):
        kw, kb = jax.random.split(k)
        scale = 1.0 / jnp.sqrt(in_dim)
        w = jax.random.uniform(kw, (out_dim, in_dim), jnp.float32, -scale, scale)
        b = jax.random.uniform(kb, (out_dim,), jnp.float32, -scale, scale)
        return w, b

    fc1_w, fc1_b = lin(ks[0], hidden, d_in)
    fc2_w, fc2_b = lin(ks[1], hidden, hidden)
    fc3_w, fc3_b = lin(ks[2], hidden, hidden)
    fc4_w, fc4_b = lin(ks[3], hidden, hidden)

    head_ws, head_bs = [], []
    for i in range(n_tasks):
        w, b = lin(ks[4 + i], 1, hidden)
        head_ws.append(w)                       # (1, H)
        head_bs.append(b)                       # (1,)
    heads_w = jnp.stack(head_ws)                # (T, 1, H)
    heads_b = jnp.concatenate(head_bs)          # (T,)

    return dict(fc1_w=fc1_w, fc1_b=fc1_b, fc2_w=fc2_w, fc2_b=fc2_b,
                fc3_w=fc3_w, fc3_b=fc3_b, fc4_w=fc4_w, fc4_b=fc4_b,
                heads_w=heads_w, heads_b=heads_b)


def reference_forward(x, y, params, weight_dtype=jnp.float32):
    """Pure-JAX reference; with weight_dtype=bf16 it mirrors the kernel's
    bf16-operand / f32-accumulate numerics exactly."""
    def q(a):
        return a.astype(weight_dtype).astype(jnp.float32)

    def lin(h, w, b):
        out = jnp.dot(h.astype(weight_dtype), w.astype(weight_dtype).T,
                      preferred_element_type=jnp.float32)
        return out + q(b)

    h = jax.nn.relu(lin(x, params["fc1_w"], params["fc1_b"]))
    h = jax.nn.relu(lin(h, params["fc2_w"], params["fc2_b"]))
    h = jax.nn.relu(lin(h, params["fc3_w"], params["fc3_b"]))
    h = jax.nn.relu(lin(h, params["fc4_w"], params["fc4_b"]))
    T, _, H = params["heads_w"].shape
    wh = params["heads_w"].reshape(T, H)
    yp = jnp.dot(h.astype(weight_dtype), wh.astype(weight_dtype).T,
                 preferred_element_type=jnp.float32) + q(params["heads_b"])
    return jnp.mean((y - yp) ** 2, axis=0)      # per-task MSE


# ----------------------------------------------------------------------------
# Main
# ----------------------------------------------------------------------------
if __name__ == "__main__":
    def run_case(key, B, d_in, hidden, n_tasks):
        kp, kx, ky = jax.random.split(key, 3)
        params = init_params(kp, d_in, hidden, n_tasks)
        p_slab = pack_params(params)                 # one-time layout packing
        x = jax.random.normal(kx, (B, d_in), jnp.float32)
        y = jax.random.normal(ky, (B, n_tasks), jnp.float32)

        losses, head_weights, fc4_weight = jax.block_until_ready(
            mtl_net_forward(x, y, p_slab, params))

        assert losses.shape == (n_tasks,)
        assert head_weights.shape == (n_tasks, 1, hidden)
        assert fc4_weight.shape == (hidden, hidden)

        # Exact-precision-mirrored reference (bf16 operands, f32 accumulate).
        ref_bf16 = reference_forward(x, y, params, weight_dtype=jnp.bfloat16)
        assert jnp.allclose(losses, ref_bf16, atol=1e-4, rtol=1e-4), (losses, ref_bf16)

        # Loose check vs. full-f32 math: bf16 weight quantization only.
        ref_f32 = reference_forward(x, y, params, weight_dtype=jnp.float32)
        assert jnp.allclose(losses, ref_f32, atol=0.2, rtol=0.2), (losses, ref_f32)

    key = jax.random.PRNGKey(0)
    k1, k2 = jax.random.split(key)
    run_case(k1, B=8, d_in=32, hidden=32, n_tasks=4)
    run_case(k2, B=8, d_in=16, hidden=32, n_tasks=3)   # exercises d_in < H path

    print("KERNEL_OK")
</pallas_src>

<mosaic_0001>
module attributes {stable_mosaic.version = 11 : i64} {
  func.func @mtl_forward_kernel(%arg0: i32, %arg1: memref<8x32xf32, #tpu.memory_space<vmem>>, %arg2: memref<8x4xf32, #tpu.memory_space<vmem>>, %arg3: memref<168x32xbf16, #tpu.memory_space<vmem>>, %arg4: memref<1x4xf32, #tpu.memory_space<vmem>>) attributes {dimension_semantics = [#tpu.dimension_semantics<arbitrary>], iteration_bounds = array<i64: 1>, scalar_prefetch = 0 : i64, scratch_operands = 0 : i64, tpu.core_type = #tpu.core_type<tc>, window_params = [{transform_indices = @transform_0, window_bounds = array<i64: 8, 32>}, {transform_indices = @transform_1, window_bounds = array<i64: 8, 4>}, {pipeline_mode = #tpu.pipeline_mode<synchronous>, transform_indices = @transform_2, window_bounds = array<i64: 168, 32>}, {pipeline_mode = #tpu.pipeline_mode<synchronous>, transform_indices = @transform_3, window_bounds = array<i64: 1, 4>}]} {
    %c0_i32 = arith.constant 0 : i32
    %0 = arith.cmpi eq, %arg0, %c0_i32 : i32
    %1 = arith.extui %0 : i1 to i32
    %c0_i32_0 = arith.constant 0 : i32
    %2 = arith.cmpi ne, %1, %c0_i32_0 : i32
    scf.if %2 {
      %cst_25 = arith.constant 0.000000e+00 : f32
      %55 = vector.broadcast %cst_25 : f32 to vector<1x4xf32>
      %c0_26 = arith.constant 0 : index
      %c0_27 = arith.constant 0 : index
      %56 = vector.load %arg4[%c0_26, %c0_27] : memref<1x4xf32, #tpu.memory_space<vmem>>, vector<1x4xf32>
      tpu.vector_store %arg4[%c0_26, %c0_27], %55 {strides = array<i32>} : memref<1x4xf32, #tpu.memory_space<vmem>>, vector<1x4xf32>,
    } else {
    }
    %c160 = arith.constant 160 : index
    %c0 = arith.constant 0 : index
    %3 = vector.load %arg3[%c160, %c0] : memref<168x32xbf16, #tpu.memory_space<vmem>>, vector<8x32xbf16>
    %4 = arith.extf %3 : vector<8x32xbf16> to vector<8x32xf32>
    %c0_1 = arith.constant 0 : index
    %c0_2 = arith.constant 0 : index
    %5 = vector.load %arg1[%c0_1, %c0_2] : memref<8x32xf32, #tpu.memory_space<vmem>>, vector<8x32xf32>
    %c0_3 = arith.constant 0 : index
    %c0_4 = arith.constant 0 : index
    %6 = vector.load %arg3[%c0_3, %c0_4] : memref<168x32xbf16, #tpu.memory_space<vmem>>, vector<32x32xbf16>
    %7 = vector.extract_strided_slice %4 {offsets = [0, 0], sizes = [1, 32], strides = [1, 1]} : vector<8x32xf32> to vector<1x32xf32>
    %8 = arith.truncf %5 : vector<8x32xf32> to vector<8x32xbf16>
    %cst = arith.constant dense<0.000000e+00> : vector<8x32xf32>
    %9 = tpu.matmul %8, %6, %cst {dimension_numbers = #tpu.dot_dimension_numbers<[1], [0], [0], [1], [0, 0, 1, 1], [], []>} : vector<8x32xbf16>, vector<32x32xbf16>, vector<8x32xf32> -> vector<8x32xf32>
    %10 = vector.broadcast %7 : vector<1x32xf32> to vector<8x32xf32>
    %11 = arith.addf %9, %10 : vector<8x32xf32>
    %cst_5 = arith.constant 0.000000e+00 : f32
    %12 = vector.broadcast %cst_5 : f32 to vector<8x32xf32>
    %13 = arith.maximumf %11, %12 : vector<8x32xf32>
    %c32 = arith.constant 32 : index
    %c0_6 = arith.constant 0 : index
    %14 = vector.load %arg3[%c32, %c0_6] : memref<168x32xbf16, #tpu.memory_space<vmem>>, vector<32x32xbf16>
    %15 = vector.extract_strided_slice %4 {offsets = [1, 0], sizes = [1, 32], strides = [1, 1]} : vector<8x32xf32> to vector<1x32xf32>
    %16 = arith.truncf %13 : vector<8x32xf32> to vector<8x32xbf16>
    %cst_7 = arith.constant dense<0.000000e+00> : vector<8x32xf32>
    %17 = tpu.matmul %16, %14, %cst_7 {dimension_numbers = #tpu.dot_dimension_numbers<[1], [0], [0], [1], [0, 0, 1, 1], [], []>} : vector<8x32xbf16>, vector<32x32xbf16>, vector<8x32xf32> -> vector<8x32xf32>
    %18 = vector.broadcast %15 : vector<1x32xf32> to vector<8x32xf32>
    %19 = arith.addf %17, %18 : vector<8x32xf32>
    %cst_8 = arith.constant 0.000000e+00 : f32
    %20 = vector.broadcast %cst_8 : f32 to vector<8x32xf32>
    %21 = arith.maximumf %19, %20 : vector<8x32xf32>
    %c64 = arith.constant 64 : index
    %c0_9 = arith.constant 0 : index
    %22 = vector.load %arg3[%c64, %c0_9] : memref<168x32xbf16, #tpu.memory_space<vmem>>, vector<32x32xbf16>
    %23 = vector.extract_strided_slice %4 {offsets = [2, 0], sizes = [1, 32], strides = [1, 1]} : vector<8x32xf32> to vector<1x32xf32>
    %24 = arith.truncf %21 : vector<8x32xf32> to vector<8x32xbf16>
    %cst_10 = arith.constant dense<0.000000e+00> : vector<8x32xf32>
    %25 = tpu.matmul %24, %22, %cst_10 {dimension_numbers = #tpu.dot_dimension_numbers<[1], [0], [0], [1], [0, 0, 1, 1], [], []>} : vector<8x32xbf16>, vector<32x32xbf16>, vector<8x32xf32> -> vector<8x32xf32>
    %26 = vector.broadcast %23 : vector<1x32xf32> to vector<8x32xf32>
    %27 = arith.addf %25, %26 : vector<8x32xf32>
    %cst_11 = arith.constant 0.000000e+00 : f32
    %28 = vector.broadcast %cst_11 : f32 to vector<8x32xf32>
    %29 = arith.maximumf %27, %28 : vector<8x32xf32>
    %c96 = arith.constant 96 : index
    %c0_12 = arith.constant 0 : index
    %30 = vector.load %arg3[%c96, %c0_12] : memref<168x32xbf16, #tpu.memory_space<vmem>>, vector<32x32xbf16>
    %31 = vector.extract_strided_slice %4 {offsets = [3, 0], sizes = [1, 32], strides = [1, 1]} : vector<8x32xf32> to vector<1x32xf32>
    %32 = arith.truncf %29 : vector<8x32xf32> to vector<8x32xbf16>
    %cst_13 = arith.constant dense<0.000000e+00> : vector<8x32xf32>
    %33 = tpu.matmul %32, %30, %cst_13 {dimension_numbers = #tpu.dot_dimension_numbers<[1], [0], [0], [1], [0, 0, 1, 1], [], []>} : vector<8x32xbf16>, vector<32x32xbf16>, vector<8x32xf32> -> vector<8x32xf32>
    %34 = vector.broadcast %31 : vector<1x32xf32> to vector<8x32xf32>
    %35 = arith.addf %33, %34 : vector<8x32xf32>
    %cst_14 = arith.constant 0.000000e+00 : f32
    %36 = vector.broadcast %cst_14 : f32 to vector<8x32xf32>
    %37 = arith.maximumf %35, %36 : vector<8x32xf32>
    %c128 = arith.constant 128 : index
    %c0_15 = arith.constant 0 : index
    %38 = vector.load %arg3[%c128, %c0_15] : memref<168x32xbf16, #tpu.memory_space<vmem>>, vector<32x32xbf16>
    %39 = vector.extract_strided_slice %4 {offsets = [4, 0], sizes = [1, 32], strides = [1, 1]} : vector<8x32xf32> to vector<1x32xf32>
    %40 = arith.truncf %37 : vector<8x32xf32> to vector<8x32xbf16>
    %cst_16 = arith.constant dense<0.000000e+00> : vector<8x32xf32>
    %41 = tpu.matmul %40, %38, %cst_16 {dimension_numbers = #tpu.dot_dimension_numbers<[1], [0], [0], [1], [0, 0, 1, 1], [], []>} : vector<8x32xbf16>, vector<32x32xbf16>, vector<8x32xf32> -> vector<8x32xf32>
    %42 = vector.broadcast %39 : vector<1x32xf32> to vector<8x32xf32>
    %43 = arith.addf %41, %42 : vector<8x32xf32>
    %c0_17 = arith.constant 0 : index
    %c0_18 = arith.constant 0 : index
    %44 = vector.load %arg2[%c0_17, %c0_18] : memref<8x4xf32, #tpu.memory_space<vmem>>, vector<8x4xf32>
    %45 = vector.extract_strided_slice %43 {offsets = [0, 0], sizes = [8, 4], strides = [1, 1]} : vector<8x32xf32> to vector<8x4xf32>
    %46 = arith.subf %44, %45 : vector<8x4xf32>
    %c0_19 = arith.constant 0 : index
    %c0_20 = arith.constant 0 : index
    %47 = vector.load %arg4[%c0_19, %c0_20] : memref<1x4xf32, #tpu.memory_space<vmem>>, vector<1x4xf32>
    %48 = arith.mulf %46, %46 : vector<8x4xf32>
    %cst_21 = arith.constant dense<0.000000e+00> : vector<4xf32>
    %49 = vector.multi_reduction <add>, %48, %cst_21 [0] : vector<8x4xf32> to vector<4xf32>
    %50 = vector.shape_cast %49 : vector<4xf32> to vector<1x4xf32>
    %cst_22 = arith.constant 1.250000e-01 : f32
    %51 = vector.broadcast %cst_22 : f32 to vector<1x4xf32>
    %52 = arith.mulf %50, %51 : vector<1x4xf32>
    %53 = arith.addf %47, %52 : vector<1x4xf32>
    %c0_23 = arith.constant 0 : index
    %c0_24 = arith.constant 0 : index
    %54 = vector.load %arg4[%c0_23, %c0_24] : memref<1x4xf32, #tpu.memory_space<vmem>>, vector<1x4xf32>
    tpu.vector_store %arg4[%c0_23, %c0_24], %53 {strides = array<i32>} : memref<1x4xf32, #tpu.memory_space<vmem>>, vector<1x4xf32>,
    return
  }
  func.func @transform_0(%arg0: i32) -> (i32, i32) {
    %c0_i32 = arith.constant 0 : i32
    %c0_i32_0 = arith.constant 0 : i32
    return %arg0, %c0_i32 : i32, i32
  }
  func.func @transform_1(%arg0: i32) -> (i32, i32) {
    %c0_i32 = arith.constant 0 : i32
    %c0_i32_0 = arith.constant 0 : i32
    return %arg0, %c0_i32 : i32, i32
  }
  func.func @transform_2(%arg0: i32) -> (i32, i32) {
    %c0_i32 = arith.constant 0 : i32
    %c0_i32_0 = arith.constant 0 : i32
    %c0_i32_1 = arith.constant 0 : i32
    return %c0_i32, %c0_i32_0 : i32, i32
  }
  func.func @transform_3(%arg0: i32) -> (i32, i32) {
    %c0_i32 = arith.constant 0 : i32
    %c0_i32_0 = arith.constant 0 : i32
    %c0_i32_1 = arith.constant 0 : i32
    return %c0_i32, %c0_i32_0 : i32, i32
  }
}

</mosaic_0001>

<bundles_post_ra>
// kernel: _mtl_losses.1
= control target key start
LH: loop header
LB: loop body
LE: loop exit
PB: predicated region body
PF: predicated region fallthrough
CT: control target
= control target key end

     0   :  { %v485_v1 = vmov 0.0   ;;  %vm486_vm0 = vmmov 0   ;;  %vm46_vm1 = vcmask 261120   ;;  %s578_s0 = inlined_call_operand.vmem [shape: f32[8,32], index: 0, kind: input, shape index: {}]   ;;  %s579_s1 = inlined_call_operand.vmem [shape: f32[8,4], index: 1, kind: input, shape index: {}]   ;;  %s580_s2 = inlined_call_operand.vmem [shape: bf16[168,32], index: 2, kind: input, shape index: {}]   ;;  %s581_s3 = inlined_call_operand.hbm [shape: f32[1,4], index: 3, kind: output, shape index: {}]  }
   0x1   :  { %v453_v0 = vld [vmem:[%s580_s2 + $0x8] sm:$0xff]   ;;  %410 = vmatprep.subr.bf16.mxu0 %v485_v1  ;;  %418 = vmatprep.subr.bf16.mxu1 %v485_v1  ;;  %v454_v2 = vld [vmem:[%s580_s2] sm:$0xff]  }
   0x2   :  { %411 = vmatpush3.bf16.msra.mxu0 %v453_v0  ;;  %414 = vmatprep.mubr.msk.bf16.mxu0 %vm486_vm0, %v485_v1  ;;  %v24_v3 = vld [vmem:[%s578_s0] sm:$0xff] }
   0x3   :  { %412 = vmatprep.subr.bf16.mxu0 %v485_v1  ;;  %422 = vmatprep.mubr.msk.bf16.mxu1 %vm486_vm0, %v485_v1  ;;  %v29_v4 = vpack.c.bf16 %v24_v3, %v24_v3 }
   0x6   :  { %413 = vmatpush3.bf16.msra.mxu0 %v454_v2 }
   0x7   :  { %426 = vmatprep.subr.bf16.mxu0 %v485_v1 }
   0x8   :  { %8 = vsyncpa [#allocation3], 0  ;;  %v455_v5 = vld [vmem:[%s580_s2 + $0x18] sm:$0xff]   ;;  %v456_v6 = vld [vmem:[%s580_s2 + $0x10] sm:$0xff]   ;;  %v30_v8 = vlaneseq  ;;  %vm20_vm2 = vcmask 24576   ;;  %vm354_vm3 = vcmask 31744  }
   0x9   :  { %415 = vmatmul.mubr.msk.bf16.vlgmr.msra.gmra.mxu0 %vm46_vm1, %v29_v4  ;;  %419 = vmatpush3.bf16.msra.mxu1 %v455_v5  ;;  %v457_v7 = vld [vmem:[%s580_s2 + $0x28] sm:$0xff]   ;;  %v22_v10 = vld [vmem:[%s580_s2 + $0x50] sm:$0xf]  ;;  %v458_v21 = vld [vmem:[%s580_s2 + $0x20] sm:$0xff]   ;;  %21 = vst.msk [vmem:[#allocation2] sm:$0x1] %vm20_vm2, %v485_v1 }
   0xa   :  { %430 = vmatprep.mubr.msk.bf16.mxu0 %vm486_vm0, %v485_v1  ;;  %420 = vmatprep.subr.bf16.mxu1 %v485_v1  ;;  %v31_v9 = vshrl.u32 %v30_v8, 7  ;;  %v23_v11 = vunpack.c.l.bf16 %v22_v10  ;;  %v459_v22 = vld [vmem:[%s580_s2 + $0x38] sm:$0xff]   ;;  %v460_v32 = vld [vmem:[%s580_s2 + $0x30] sm:$0xff]   ;;  %v461_v33 = vld [vmem:[%s580_s2 + $0x48] sm:$0xff]   ;;  %s487_s9 = smov [#allocation2]  }
   0xb   :  { %427 = vmatpush3.bf16.msra.mxu0 %v457_v7  ;;  %v462_v43 = vld [vmem:[%s580_s2 + $0x40] sm:$0xff]   ;;  %s372_s10 = sshll.u32 %s487_s9, 4  ;;  %s373_s10 = int_to_ptr.vmem [resolvable:$true] %s372_s10 }
   0xc   :  { %428 = vmatprep.subr.bf16.mxu0 %v485_v1  ;;  %v32_v12 = vsub.s32 0, %v31_v9  ;;  %v98_v23 = vsub.s32 1, %v31_v9  ;;  %v163_v34 = vsub.s32 2, %v31_v9  ;;  %v228_v44 = vsub.s32 3, %v31_v9  ;;  %v350_v56 = vld [vmem:[%s579_s1] sm:$0xff]  ;;  %s463_s1 = scalar_lea.vmem %s373_s10, 16  ;;  %p468_p1 = scmp.lt.s32.totalorder %s373_s10, %s373_s10 }
   0xd   :  { %421 = vmatpush3.bf16.msra.mxu1 %v456_v6  ;;  %v293_v53 = vsub.s32 4, %v31_v9  ;;  %p464_p0 = scmp.ne.s32.totalorder %s373_s10, %s463_s1  ;;  %s467_s11 = scalar_lea.vmem %s373_s10, 32 }
   0xe   :  { %434 = vmatprep.subr.bf16.mxu1 %v485_v1  ;;  %v33_v13 = vrot.slane %v23_v11, %v32_v12  ;;  %v99_v24 = vrot.slane %v23_v11, %v98_v23  ;;  %v164_v35 = vrot.slane %v23_v11, %v163_v34  ;;  %v229_v45 = vrot.slane %v23_v11, %v228_v44  ;;  %p469_p2 = scmp.lt.s32.totalorder %s467_s11, %s463_s1 }
   0xf   :  { %429 = vmatpush3.bf16.msra.mxu0 %v458_v21  ;;  %v294_v54 = vrot.slane %v23_v11, %v293_v53 }
  0x10   :  { %442 = vmatprep.subr.bf16.mxu0 %v485_v1  ;;  %v352_v6 = vld [vmem:[#allocation2] sm:$0x1]  ;;  %p470_p3 = por %p469_p2, %p468_p1 }
  0x12   :  { %p471_p4 = pnand %p470_p3, %p464_p0 }
  0xc9   :  { %v84_v14 = vpop.f32.mrf.mxu0 }
  0xca   :  { %v85_v15 = vadd.f32 %v84_v14, %v33_v13 }
  0xcb   :  { %v416_v16 = vpop.f32.mrf.mxu0 }
  0xcc   :  { %v90_v17 = vmax.f32 %v85_v15, 0.0 }
  0xcd   :  { %v87_v18 = vpop.f32.mrf.mxu0 }
  0xce   :  { %v95_v19 = vpack.c.bf16 %v90_v17, %v90_v17 }
  0xcf   :  { %v417_v20 = vpop.f32.mrf.mxu0 }
  0xd0   :  { %423 = vmatmul.mubr.msk.bf16.vlgmr.msra.gmra.mxu1 %vm46_vm1, %v95_v19 }
  0xd1   :  { %438 = vmatprep.mubr.msk.bf16.mxu1 %vm486_vm0, %v485_v1  ;;  %435 = vmatpush3.bf16.msra.mxu1 %v459_v22 }
  0xd2   :  { %436 = vmatprep.subr.bf16.mxu1 %v485_v1 }
  0xd5   :  { %437 = vmatpush3.bf16.msra.mxu1 %v460_v32 }
 0x190   :  { %v149_v25 = vpop.f32.mrf.mxu1 }
 0x191   :  { %v150_v26 = vadd.f32 %v149_v25, %v99_v24 }
 0x192   :  { %v424_v27 = vpop.f32.mrf.mxu1 }
 0x193   :  { %v155_v28 = vmax.f32 %v150_v26, 0.0 }
 0x194   :  { %v152_v29 = vpop.f32.mrf.mxu1 }
 0x195   :  { %v160_v30 = vpack.c.bf16 %v155_v28, %v155_v28 }
 0x196   :  { %v425_v31 = vpop.f32.mrf.mxu1 }
 0x197   :  { %431 = vmatmul.mubr.msk.bf16.vlgmr.msra.gmra.mxu0 %vm46_vm1, %v160_v30 }
 0x198   :  { %446 = vmatprep.mubr.msk.bf16.mxu0 %vm486_vm0, %v485_v1  ;;  %443 = vmatpush3.bf16.msra.mxu0 %v461_v33 }
 0x199   :  { %444 = vmatprep.subr.bf16.mxu0 %v485_v1 }
 0x19c   :  { %445 = vmatpush3.bf16.msra.mxu0 %v462_v43 }
 0x257   :  { %v214_v36 = vpop.f32.mrf.mxu0 }
 0x258   :  { %v215_v37 = vadd.f32 %v214_v36, %v164_v35 }
 0x259   :  { %v432_v38 = vpop.f32.mrf.mxu0 }
 0x25a   :  { %v220_v39 = vmax.f32 %v215_v37, 0.0 }
 0x25b   :  { %v217_v40 = vpop.f32.mrf.mxu0 }
 0x25c   :  { %v225_v41 = vpack.c.bf16 %v220_v39, %v220_v39 }
 0x25d   :  { %v433_v42 = vpop.f32.mrf.mxu0 }
 0x25e   :  { %439 = vmatmul.mubr.msk.bf16.vlgmr.msra.gmra.mxu1 %vm46_vm1, %v225_v41 }
 0x31e   :  { %v279_v46 = vpop.f32.mrf.mxu1 }
 0x31f   :  { %v280_v47 = vadd.f32 %v279_v46, %v229_v45 }
 0x320   :  { %v440_v48 = vpop.f32.mrf.mxu1 }
 0x321   :  { %v285_v49 = vmax.f32 %v280_v47, 0.0 }
 0x322   :  { %v282_v50 = vpop.f32.mrf.mxu1 }
 0x323   :  { %v290_v51 = vpack.c.bf16 %v285_v49, %v285_v49 }
 0x324   :  { %v441_v52 = vpop.f32.mrf.mxu1 }
 0x325   :  { %447 = vmatmul.mubr.msk.bf16.vlgmr.msra.gmra.mxu0 %vm46_vm1, %v290_v51 }
 0x3e5   :  { %v344_v55 = vpop.f32.mrf.mxu0 }
 0x3e6   :  { %v345_v57 = vadd.f32 %v344_v55, %v294_v54 }
 0x3e7   :  { %v448_v58 = vpop.f32.mrf.mxu0 }
 0x3e8   :  { %v351_v59 = vsub.f32 %v350_v56, %v345_v57 }
 0x3e9   :  { %v347_v60 = vpop.f32.mrf.mxu0 }
 0x3ea   :  { %v353_v61 = vmul.f32 %v351_v59, %v351_v59 }
 0x3eb   :  { %v449_v62 = vpop.f32.mrf.mxu0 }
 0x3ec   :  { %v355_v63 = vsel %vm354_vm3, %v353_v61, 0.0 }
 0x3ed   :  { %v356_v0 = vrot.slane %v355_v63, 4 }
 0x3ef   :  { %v357_v2 = vadd.f32 %v356_v0, %v355_v63 }
 0x3f1   :  { %v358_v3 = vrot.slane %v357_v2, 2 }
 0x3f3   :  { %v359_v4 = vadd.f32 %v358_v3, %v357_v2 }
 0x3f5   :  { %v360_v1 = vrot.slane %v359_v4, 1 }
 0x3f7   :  { %v361_v5 = vadd.f32 %v360_v1, %v359_v4 }
 0x3f9   :  { %v362_v7 = vmul.f32 0.125, %v361_v5 }
 0x3fb   :  { %v363_v8 = vadd.f32 %v362_v7, %v352_v6 }
 0x3fd   :  { %365 = vst.msk [vmem:[#allocation2] sm:$0x1] %vm20_vm2, %v363_v8 }
 0x3fe   :  { %474 = shalt.err (!%p471_p4)
}
 0x3ff   :  { %375 = dma.vmem_to_hbm [thread:$0]  %s373_s10, 16, %s581_s3, [#allocation3]  }
 0x400   :  { %483 = dma.done.wait [#allocation3], 16  }
 0x401   :  { %484 = vsyncadd [#allocation3], 4294967280 }
 0x402   :  { %379 = vsyncpa [#allocation3], 1 }

</bundles_post_ra>
